<compile_context>
chip_gen: v5e
topology: v5e:2x2
jax: 0.10.0
libtpu: 0.0.40
codegen_flags: <defaults>
</compile_context>

<pallas_src>
import numpy as np
import jax
import jax.numpy as jnp
from jax.experimental import pallas as pl
from jax.experimental.pallas import tpu as pltpu

# ---------------------------------------------------------------------------
# Model hyper-parameters (small, consistent with the module's __init__)
# ---------------------------------------------------------------------------
NUM_FEATURES = 8       # num_features (must divide 128)
DEGREE = 3             # degree (QSVT / LCU degree)
KAN_DEGREE = 3         # Chebyshev degree of the KAN edge functions
BATCH = 512            # example batch size

LANES = 128            # TPU vreg lane width
MAX_BATCH_TILE = 4096  # samples per grid step at large batch (128 KiB f32 block)


# ---------------------------------------------------------------------------
# Pallas kernel: fused QSVT-surrogate + LCU + sum-block + KAN layer
# ---------------------------------------------------------------------------
def qkan_kernel(x_ref, coef_ref, sel_ref, bias_ref, o_ref):
    # x_ref    : (TR, 128)             rows of (128/F) samples x F features
    # coef_ref : (DEGREE+KAN_DEGREE+1, 128)  packed per-lane coefficients
    #            rows [0, DEGREE)           -> effective LCU weights
    #            rows [DEGREE, DEGREE+K+1)  -> KAN Chebyshev coefficients
    # sel_ref  : (128, SPR)            lane-group -> sample selector (0/1)
    # bias_ref : (1, 1) in SMEM        KAN bias
    # o_ref    : (TR, SPR)             per-sample outputs (row-major sample order)
    x = x_ref[...]
    coef = coef_ref[...]

    t = jnp.tanh(x)                        # squash into [-1, 1]  (EUP slot)
    t2 = t + t                             # hoisted 2*t for the recurrence

    # --- QSVT surrogate + LCU + QuantumSumBlock, fused -----------------------
    # feat[row, l] = sum_k w_eff[l % F, k] * T_{k+1}(t[row, l])
    cur = t                                # T_1
    prev = None                            # T_0 == 1 handled as a literal
    feat = coef[0:1, :] * cur
    for k in range(1, DEGREE):
        nxt = t2 * cur - (1.0 if prev is None else prev)
        prev, cur = cur, nxt
        feat = feat + coef[k:k + 1, :] * cur
    # (no recurrence update is wasted after the last accumulation)

    # --- KAN layer (Chebyshev edge functions, out_features = 1) --------------
    s = jnp.tanh(feat)                     # (TR, 128)   (EUP slot)
    c0 = coef[DEGREE:DEGREE + 1, :]
    if KAN_DEGREE == 0:
        acc = jnp.broadcast_to(c0, x.shape)
    else:
        s2 = s + s
        cur = s                            # T_1
        prev = None
        acc = c0 + coef[DEGREE + 1:DEGREE + 2, :] * cur   # c0*T_0 + c1*T_1
        for j in range(2, KAN_DEGREE + 1):
            nxt = s2 * cur - (1.0 if prev is None else prev)
            prev, cur = cur, nxt
            acc = acc + coef[DEGREE + j:DEGREE + j + 1, :] * cur

    # --- feature contraction: one MXU matmul with the block-diagonal selector
    # (sum over the F lanes of each sample), instead of cross-lane reductions.
    y = jnp.dot(acc, sel_ref[...], preferred_element_type=jnp.float32)  # (TR, SPR)
    o_ref[...] = y + bias_ref[0, 0]


# ---------------------------------------------------------------------------
# Tiling policy (generation-aware)
# ---------------------------------------------------------------------------
def _cdiv(a, b):
    return -(-a // b)


def _round_up(x, m):
    return _cdiv(x, m) * m


def _num_tensorcores():
    """Best-effort TensorCore count (v7x = 2, v5e/v6e = 1). Conservative default 1."""
    try:
        info = pltpu.get_tpu_info()
    except Exception:
        return 1
    for attr in ("num_cores", "core_count", "cores_per_chip", "tensorcore_count"):
        v = getattr(info, attr, None)
        if isinstance(v, int) and v > 0:
            return v
    return 1


def _choose_batch_tile(batch, num_cores):
    """Batch tile = multiple of 128 samples (8 vreg rows of 128/F samples).

    * 1 TensorCore (v5e/v6e): a single grid step whenever the batch fits one
      MAX_BATCH_TILE tile (per-step pipeline overhead dominates otherwise).
    * >=2 TensorCores (v7x): at least 2 steps so ("parallel",) shards the batch.
    * Large batch: ~MAX_BATCH_TILE tiles, step count chosen to minimize padding.
    """
    b128 = _round_up(max(batch, 1), 128)
    min_steps = 2 if (num_cores > 1 and b128 >= 256) else 1
    steps = max(min_steps, _cdiv(b128, MAX_BATCH_TILE))
    return _round_up(_cdiv(b128, steps), 128)


# ---------------------------------------------------------------------------
# Wrapper
# ---------------------------------------------------------------------------
@jax.jit
def quantum_kan_regressor(x, lcu_weights, qsvt_phases, kan_coeff, kan_bias):
    """x: (B, F) float32 -> (B, 1) float32."""
    B, F = x.shape
    assert LANES % F == 0, "num_features must divide the 128-lane vreg width"
    spr = LANES // F                                   # samples per vreg row

    # --- parameter preprocessing (tiny, fused by jit; packed into ONE operand)
    lcu_norm = jnp.maximum(jnp.sum(jnp.abs(lcu_weights), axis=1, keepdims=True),
                           1e-12)                                        # (F, 1)
    w_eff = (jnp.cos(qsvt_phases)[None, :] * lcu_weights) / lcu_norm     # (F, DEG)
    coef_qsvt = jnp.tile(jnp.transpose(w_eff).astype(jnp.float32), (1, spr))
    coef_kan = jnp.tile(kan_coeff.astype(jnp.float32), (1, spr))
    coef = jnp.concatenate([coef_qsvt, coef_kan], axis=0)  # (DEG+K+1, 128)
    bias2d = kan_bias.reshape(1, 1).astype(jnp.float32)

    # lane-group -> sample selector (trace-time numpy constant)
    sel = np.equal(np.arange(LANES)[:, None] // F,
                   np.arange(spr)[None, :]).astype(np.float32)           # (128, spr)

    # --- batch layout WITHOUT a transpose: row-major (B, F) reshapes for free
    # into (B/spr, 128) rows; pad only when B is not a tile multiple.
    tile = _choose_batch_tile(B, _num_tensorcores())
    b_pad = _round_up(B, tile)
    xf = x.astype(jnp.float32)
    if b_pad != B:
        xf = jnp.pad(xf, ((0, b_pad - B), (0, 0)))
    x_rows = xf.reshape(b_pad // spr, LANES)
    tr = tile // spr                                   # kernel-tile rows (mult of 8)

    n_coef = DEGREE + KAN_DEGREE + 1
    cost = pl.CostEstimate(
        flops=B * F * (4 * DEGREE + 4 * KAN_DEGREE + 6),
        transcendentals=2 * B * F,
        bytes_accessed=4 * B * F + 4 * B + 4 * (n_coef * LANES + LANES * spr),
    )

    out = pl.pallas_call(
        qkan_kernel,
        out_shape=jax.ShapeDtypeStruct((b_pad // spr, spr), jnp.float32),
        grid=(b_pad // tile,),
        in_specs=[
            pl.BlockSpec((tr, LANES), lambda i: (i, 0)),           # x rows (lane-dense)
            pl.BlockSpec((n_coef, LANES), lambda i: (0, 0)),       # packed coefficients
            pl.BlockSpec((LANES, spr), lambda i: (0, 0)),          # feature selector
            pl.BlockSpec(memory_space=pltpu.MemorySpace.SMEM),     # bias scalar
        ],
        out_specs=pl.BlockSpec((tr, spr), lambda i: (i, 0)),
        compiler_params=pltpu.CompilerParams(
            dimension_semantics=("parallel",)),
        cost_estimate=cost,
    )(x_rows, coef, sel, bias2d)

    # rows are in row-major sample order -> flatten directly to (B, 1)
    return out.reshape(b_pad, 1)[:B]


# ---------------------------------------------------------------------------
# Pure-JAX reference (same math, unfused) for a correctness check
# ---------------------------------------------------------------------------
def reference(x, lcu_weights, qsvt_phases, kan_coeff, kan_bias):
    t = jnp.tanh(x)                                             # (B, F)
    chebs = [t]                                                 # T_1..T_DEGREE
    tp, tc = jnp.ones_like(t), t
    for _ in range(DEGREE - 1):
        tn = 2.0 * t * tc - tp
        chebs.append(tn)
        tp, tc = tc, tn
    qsvt = jnp.stack(chebs, axis=-1) * jnp.cos(qsvt_phases)     # (B, F, DEG)
    lcu_norm = jnp.maximum(jnp.sum(jnp.abs(lcu_weights), axis=1), 1e-12)  # (F,)
    lcu = qsvt * lcu_weights[None] / lcu_norm[None, :, None]    # (B, F, DEG)
    feat = jnp.sum(lcu, axis=-1)                                # (B, F)
    s = jnp.tanh(feat)
    cheb_s = [jnp.ones_like(s), s]
    for _ in range(KAN_DEGREE - 1):
        cheb_s.append(2.0 * s * cheb_s[-1] - cheb_s[-2])
    basis = jnp.stack(cheb_s, axis=0)                           # (K+1, B, F)
    y = jnp.einsum("kbf,kf->b", basis, kan_coeff)[:, None] + kan_bias
    return y


if __name__ == "__main__":
    key = jax.random.PRNGKey(0)
    k_x, k_lcu, k_kan, k_bias = jax.random.split(key, 4)

    # deterministic example input and parameters
    X = jax.random.normal(k_x, (BATCH, NUM_FEATURES), dtype=jnp.float32)
    lcu_weights = jax.random.uniform(
        k_lcu, (NUM_FEATURES, DEGREE), dtype=jnp.float32)       # torch.rand analogue
    qsvt_phases = jnp.linspace(0.1, 1.0, DEGREE, dtype=jnp.float32)
    kan_coeff = 0.1 * jax.random.normal(
        k_kan, (KAN_DEGREE + 1, NUM_FEATURES), dtype=jnp.float32)
    kan_bias = 0.05 * jax.random.normal(k_bias, (1,), dtype=jnp.float32)

    # tile-aligned batch (no padding path)
    y = quantum_kan_regressor(X, lcu_weights, qsvt_phases, kan_coeff, kan_bias)
    y = jax.block_until_ready(y)
    y_ref = reference(X, lcu_weights, qsvt_phases, kan_coeff, kan_bias)
    assert y.shape == (BATCH, 1)
    assert jnp.allclose(y, y_ref, atol=1e-5, rtol=1e-5)

    # non-aligned batch (exercises the padding path)
    X2 = X[:200]
    y2 = quantum_kan_regressor(X2, lcu_weights, qsvt_phases, kan_coeff, kan_bias)
    y2 = jax.block_until_ready(y2)
    y2_ref = reference(X2, lcu_weights, qsvt_phases, kan_coeff, kan_bias)
    assert y2.shape == (200, 1)
    assert jnp.allclose(y2, y2_ref, atol=1e-5, rtol=1e-5)

    print("KERNEL_OK")
</pallas_src>

<mosaic_0001>
module attributes {stable_mosaic.version = 11 : i64} {
  func.func @qkan_kernel(%arg0: i32, %arg1: memref<32x128xf32, #tpu.memory_space<vmem>>, %arg2: memref<7x128xf32, #tpu.memory_space<vmem>>, %arg3: memref<128x16xf32, #tpu.memory_space<vmem>>, %arg4: memref<1x1xf32, #tpu.memory_space<smem>>, %arg5: memref<32x16xf32, #tpu.memory_space<vmem>>) attributes {dimension_semantics = [#tpu.dimension_semantics<parallel>], iteration_bounds = array<i64: 1>, scalar_prefetch = 0 : i64, scratch_operands = 0 : i64, tpu.core_type = #tpu.core_type<tc>, window_params = [{transform_indices = @transform_0, window_bounds = array<i64: 32, 128>}, {pipeline_mode = #tpu.pipeline_mode<synchronous>, transform_indices = @transform_1, window_bounds = array<i64: 7, 128>}, {pipeline_mode = #tpu.pipeline_mode<synchronous>, transform_indices = @transform_2, window_bounds = array<i64: 128, 16>}, {transform_indices = @transform_3, window_bounds = array<i64: 1, 1>}, {transform_indices = @transform_4, window_bounds = array<i64: 32, 16>}]} {
    %c0 = arith.constant 0 : index
    %c0_0 = arith.constant 0 : index
    %0 = vector.load %arg1[%c0, %c0_0] : memref<32x128xf32, #tpu.memory_space<vmem>>, vector<32x128xf32>
    %c0_1 = arith.constant 0 : index
    %c0_2 = arith.constant 0 : index
    %1 = vector.load %arg2[%c0_1, %c0_2] : memref<7x128xf32, #tpu.memory_space<vmem>>, vector<7x128xf32>
    %2 = math.tanh %0 : vector<32x128xf32>
    %3 = arith.addf %2, %2 : vector<32x128xf32>
    %4 = vector.extract_strided_slice %1 {offsets = [0, 0], sizes = [1, 128], strides = [1, 1]} : vector<7x128xf32> to vector<1x128xf32>
    %5 = vector.broadcast %4 : vector<1x128xf32> to vector<32x128xf32>
    %6 = arith.mulf %5, %2 : vector<32x128xf32>
    %7 = arith.mulf %3, %2 : vector<32x128xf32>
    %cst = arith.constant 1.000000e+00 : f32
    %8 = vector.broadcast %cst : f32 to vector<32x128xf32>
    %9 = arith.subf %7, %8 : vector<32x128xf32>
    %10 = vector.extract_strided_slice %1 {offsets = [1, 0], sizes = [1, 128], strides = [1, 1]} : vector<7x128xf32> to vector<1x128xf32>
    %11 = vector.broadcast %10 : vector<1x128xf32> to vector<32x128xf32>
    %12 = arith.mulf %11, %9 : vector<32x128xf32>
    %13 = arith.addf %6, %12 : vector<32x128xf32>
    %14 = arith.mulf %3, %9 : vector<32x128xf32>
    %15 = arith.subf %14, %2 : vector<32x128xf32>
    %16 = vector.extract_strided_slice %1 {offsets = [2, 0], sizes = [1, 128], strides = [1, 1]} : vector<7x128xf32> to vector<1x128xf32>
    %17 = vector.broadcast %16 : vector<1x128xf32> to vector<32x128xf32>
    %18 = arith.mulf %17, %15 : vector<32x128xf32>
    %19 = arith.addf %13, %18 : vector<32x128xf32>
    %20 = math.tanh %19 : vector<32x128xf32>
    %21 = vector.extract_strided_slice %1 {offsets = [3, 0], sizes = [1, 128], strides = [1, 1]} : vector<7x128xf32> to vector<1x128xf32>
    %22 = arith.addf %20, %20 : vector<32x128xf32>
    %23 = vector.extract_strided_slice %1 {offsets = [4, 0], sizes = [1, 128], strides = [1, 1]} : vector<7x128xf32> to vector<1x128xf32>
    %24 = vector.broadcast %23 : vector<1x128xf32> to vector<32x128xf32>
    %25 = arith.mulf %24, %20 : vector<32x128xf32>
    %26 = vector.broadcast %21 : vector<1x128xf32> to vector<32x128xf32>
    %27 = arith.addf %26, %25 : vector<32x128xf32>
    %28 = arith.mulf %22, %20 : vector<32x128xf32>
    %cst_3 = arith.constant 1.000000e+00 : f32
    %29 = vector.broadcast %cst_3 : f32 to vector<32x128xf32>
    %30 = arith.subf %28, %29 : vector<32x128xf32>
    %31 = vector.extract_strided_slice %1 {offsets = [5, 0], sizes = [1, 128], strides = [1, 1]} : vector<7x128xf32> to vector<1x128xf32>
    %32 = vector.broadcast %31 : vector<1x128xf32> to vector<32x128xf32>
    %33 = arith.mulf %32, %30 : vector<32x128xf32>
    %34 = arith.addf %27, %33 : vector<32x128xf32>
    %35 = arith.mulf %22, %30 : vector<32x128xf32>
    %36 = arith.subf %35, %20 : vector<32x128xf32>
    %37 = vector.extract_strided_slice %1 {offsets = [6, 0], sizes = [1, 128], strides = [1, 1]} : vector<7x128xf32> to vector<1x128xf32>
    %38 = vector.broadcast %37 : vector<1x128xf32> to vector<32x128xf32>
    %39 = arith.mulf %38, %36 : vector<32x128xf32>
    %40 = arith.addf %34, %39 : vector<32x128xf32>
    %c0_4 = arith.constant 0 : index
    %c0_5 = arith.constant 0 : index
    %41 = vector.load %arg3[%c0_4, %c0_5] : memref<128x16xf32, #tpu.memory_space<vmem>>, vector<128x16xf32>
    %cst_6 = arith.constant dense<0.000000e+00> : vector<32x16xf32>
    %42 = tpu.matmul %40, %41, %cst_6 {dimension_numbers = #tpu.dot_dimension_numbers<[1], [0], [0], [1], [0, 0, 1, 1], [], []>} : vector<32x128xf32>, vector<128x16xf32>, vector<32x16xf32> -> vector<32x16xf32>
    %c0_7 = arith.constant 0 : index
    %c0_8 = arith.constant 0 : index
    %43 = memref.load %arg4[%c0_7, %c0_8] : memref<1x1xf32, #tpu.memory_space<smem>>
    %44 = vector.broadcast %43 : f32 to vector<32x16xf32>
    %45 = arith.addf %42, %44 : vector<32x16xf32>
    %c0_9 = arith.constant 0 : index
    %c0_10 = arith.constant 0 : index
    %46 = vector.load %arg5[%c0_9, %c0_10] : memref<32x16xf32, #tpu.memory_space<vmem>>, vector<32x16xf32>
    tpu.vector_store %arg5[%c0_9, %c0_10], %45 {strides = array<i32>} : memref<32x16xf32, #tpu.memory_space<vmem>>, vector<32x16xf32>,
    return
  }
  func.func @transform_0(%arg0: i32) -> (i32, i32) {
    %c0_i32 = arith.constant 0 : i32
    %c0_i32_0 = arith.constant 0 : i32
    return %arg0, %c0_i32 : i32, i32
  }
  func.func @transform_1(%arg0: i32) -> (i32, i32) {
    %c0_i32 = arith.constant 0 : i32
    %c0_i32_0 = arith.constant 0 : i32
    %c0_i32_1 = arith.constant 0 : i32
    return %c0_i32, %c0_i32_0 : i32, i32
  }
  func.func @transform_2(%arg0: i32) -> (i32, i32) {
    %c0_i32 = arith.constant 0 : i32
    %c0_i32_0 = arith.constant 0 : i32
    %c0_i32_1 = arith.constant 0 : i32
    return %c0_i32, %c0_i32_0 : i32, i32
  }
  func.func @transform_3(%arg0: i32) -> (i32, i32) {
    %c0_i32 = arith.constant 0 : i32
    %c0_i32_0 = arith.constant 0 : i32
    %c0_i32_1 = arith.constant 0 : i32
    return %c0_i32, %c0_i32_0 : i32, i32
  }
  func.func @transform_4(%arg0: i32) -> (i32, i32) {
    %c0_i32 = arith.constant 0 : i32
    %c0_i32_0 = arith.constant 0 : i32
    return %arg0, %c0_i32 : i32, i32
  }
}

</mosaic_0001>

<bundles_post_ra>
// kernel: tile.19
= control target key start
LH: loop header
LB: loop body
LE: loop exit
PB: predicated region body
PF: predicated region fallthrough
CT: control target
= control target key end

     0   :  { %vm6_vm0 = vcmask 1043458   ;;  %s11_s6 = smov 3  ;;  %s14_s7 = smov 12  ;;  %vm8_vm1 = vcmask 64512   ;;  %vm20_vm2 = vcmask 1048512   ;;  %vm32_vm3 = vcmask 982912   ;;  %s381_s0 = inlined_call_operand.vmem [shape: f32[4,16,8], index: 0, kind: input, shape index: {}]   ;;  %s382_s1 = inlined_call_operand.vmem [shape: f32[4,128], index: 1, kind: output, shape index: {}]  }
   0x1   :  { %v196_v0 = vld [vmem:[%s381_s0 + $0xf] ss:$16 sm:%s11_s6]   ;;  %s35_s12 = smov 3  ;;  %s38_s15 = smov 12  ;;  %vm44_vm4 = vcmask 917312   ;;  %vm56_vm5 = vcmask 851712  }
   0x2   :  { %v197_v1 = vld [vmem:[%s381_s0 + $0xf] ss:$16 sm:%s14_s7]   ;;  %v200_v3 = vld [vmem:[%s381_s0 + $0xd] ss:$16 sm:%s35_s12]   ;;  %s241_s16 = smov 120   ;;  %s23_s19 = smov 3 }
   0x3   :  { %v17_v2 = vsel %vm6_vm0, %v197_v1, %v196_v0  ;;  %v201_v4 = vld [vmem:[%s381_s0 + $0xd] ss:$16 sm:%s38_s15]   ;;  %s26_s20 = smov 12  ;;  %v198_v6 = vld [vmem:[%s381_s0 + $0xe] ss:$16 sm:%s23_s19]   ;;  %s47_s23 = smov 3 }
   0x4   :  { %18 = vrot.lane.b32.xlu0 %v17_v2, %s241_s16  ;;  %v41_v5 = vsel %vm6_vm0, %v201_v4, %v200_v3  ;;  %s242_s24 = smov 104   ;;  %v199_v7 = vld [vmem:[%s381_s0 + $0xe] ss:$16 sm:%s26_s20]   ;;  %s50_s27 = smov 12  ;;  %vm68_vm6 = vcmask 786112   ;;  %vm80_vm7 = vcmask 720512  }
   0x5   :  { %42 = vrot.lane.b32.xlu1 %v41_v5, %s242_s24  ;;  %v202_v8 = vld [vmem:[%s381_s0 + $0xc] ss:$16 sm:%s47_s23]   ;;  %v29_v10 = vsel %vm6_vm0, %v199_v7, %v198_v6  ;;  %s83_s3 = smov 3  ;;  %s86_s4 = smov 12  ;;  %vm92_vm8 = vcmask 654912   ;;  %vm104_vm9 = vcmask 589312  }
   0x6   :  { %v203_v9 = vld [vmem:[%s381_s0 + $0xc] ss:$16 sm:%s50_s27]   ;;  %s243_s5 = smov 112   ;;  %s95_s6 = smov 3  ;;  %v208_v12 = vld [vmem:[%s381_s0 + $0x9] ss:$16 sm:%s83_s3]  }
   0x7   :  { %v53_v11 = vsel %vm6_vm0, %v203_v9, %v202_v8  ;;  %s98_s7 = smov 12  ;;  %v209_v13 = vld [vmem:[%s381_s0 + $0x9] ss:$16 sm:%s86_s4]   ;;  %s59_s12 = smov 3  ;;  %v210_v16 = vld [vmem:[%s381_s0 + $0x8] ss:$16 sm:%s95_s6]  }
   0x8   :  { %s62_s13 = smov 12  ;;  %s244_s14 = smov 96   ;;  %v204_v14 = vld [vmem:[%s381_s0 + $0xb] ss:$16 sm:%s59_s12]   ;;  %v211_v17 = vld [vmem:[%s381_s0 + $0x8] ss:$16 sm:%s98_s7]   ;;  %v89_v19 = vsel %vm6_vm0, %v209_v13, %v208_v12 }
   0x9   :  { %v205_v15 = vld [vmem:[%s381_s0 + $0xb] ss:$16 sm:%s62_s13]   ;;  %s245_s23 = smov 88   ;;  %s71_s24 = smov 3  ;;  %v101_v20 = vsel %vm6_vm0, %v211_v17, %v210_v16  ;;  %vm116_vm10 = vcmask 523712   ;;  %vm128_vm11 = vcmask 458112  }
   0xa   :  { %v65_v18 = vsel %vm6_vm0, %v205_v15, %v204_v14  ;;  %s119_s25 = smov 3  ;;  %s74_s26 = smov 12  ;;  %v206_v21 = vld [vmem:[%s381_s0 + $0xa] ss:$16 sm:%s71_s24]   ;;  %vm140_vm12 = vcmask 392512   ;;  %vm152_vm13 = vcmask 326912  }
   0xb   :  { %66 = vrot.lane.b32.xlu2 %v65_v18, %s245_s23  ;;  %s122_s27 = smov 12  ;;  %v207_v22 = vld [vmem:[%s381_s0 + $0xa] ss:$16 sm:%s74_s26]   ;;  %s246_s3 = smov 72   ;;  %vm164_vm14 = vcmask 261312   ;;  %vm176_vm15 = vcmask 195712  }
   0xc   :  { %30 = vrot.lane.b32.xlu0 %v29_v10, %s243_s5  ;;  %v214_v23 = vld [vmem:[%s381_s0 + $0x6] ss:$16 sm:%s119_s25]   ;;  %s131_s6 = smov 3  ;;  %s134_s7 = smov 12  ;;  %v77_v25 = vsel %vm6_vm0, %v207_v22, %v206_v21 }
   0xd   :  { %54 = vrot.lane.b32.xlu1 %v53_v11, %s244_s14  ;;  %s247_s8 = smov 64   ;;  %v215_v24 = vld [vmem:[%s381_s0 + $0x6] ss:$16 sm:%s122_s27]   ;;  %s107_s15 = smov 3 }
   0xe   :  { %v216_v26 = vld [vmem:[%s381_s0 + $0x5] ss:$16 sm:%s131_s6]   ;;  %s110_s16 = smov 12  ;;  %v125_v28 = vsel %vm6_vm0, %v215_v24, %v214_v23  ;;  %s248_s17 = smov 80   ;;  %v212_v30 = vld [vmem:[%s381_s0 + $0x7] ss:$16 sm:%s107_s15]  }
   0xf   :  { %v217_v27 = vld [vmem:[%s381_s0 + $0x5] ss:$16 sm:%s134_s7]   ;;  %s155_s18 = smov 3  ;;  %s158_s19 = smov 12  ;;  %v213_v31 = vld [vmem:[%s381_s0 + $0x7] ss:$16 sm:%s110_s16]  }
  0x10   :  { %v137_v29 = vsel %vm6_vm0, %v217_v27, %v216_v26  ;;  %s249_s24 = smov 48   ;;  %v220_v32 = vld [vmem:[%s381_s0 + $0x3] ss:$16 sm:%s155_s18]   ;;  %s167_s27 = smov 3  ;;  %v113_v34 = vsel %vm6_vm0, %v213_v31, %v212_v30 }
  0x11   :  { %s170_s28 = smov 12  ;;  %s250_s29 = smov 40   ;;  %v221_v33 = vld [vmem:[%s381_s0 + $0x3] ss:$16 sm:%s158_s19]   ;;  %v222_v35 = vld [vmem:[%s381_s0 + $0x2] ss:$16 sm:%s167_s27]  }
  0x12   :  { %v223_v36 = vld [vmem:[%s381_s0 + $0x2] ss:$16 sm:%s170_s28]   ;;  %s143_s7 = smov 3  ;;  %v161_v37 = vsel %vm6_vm0, %v221_v33, %v220_v32  ;;  %s251_s9 = smov 56  }
  0x13   :  { %78 = vrot.lane.b32.xlu2 %v77_v25, %s248_s17  ;;  %v173_v38 = vsel %vm6_vm0, %v223_v36, %v222_v35  ;;  %v218_v39 = vld [vmem:[%s381_s0 + $0x4] ss:$16 sm:%s143_s7]   ;;  %s252_s14 = smov 24   ;;  %s253_s15 = smov 16  }
  0x14   :  { %90 = vrot.lane.b32.xlu0 %v89_v19, %s246_s3  ;;  %s179_s16 = smov 3  ;;  %s182_s17 = smov 12 }
  0x15   :  { %102 = vrot.lane.b32.xlu1 %v101_v20, %s247_s8  ;;  %s146_s8 = smov 12  ;;  %s254_s18 = smov 32   ;;  %v224_v42 = vld [vmem:[%s381_s0 + $0x1] ss:$16 sm:%s179_s16]  }
  0x16   :  { %v219_v40 = vld [vmem:[%s381_s0 + $0x4] ss:$16 sm:%s146_s8]   ;;  %v225_v43 = vld [vmem:[%s381_s0 + $0x1] ss:$16 sm:%s182_s17]   ;;  %s255_s23 = smov 8   ;;  %s4_s25 = smov 12 }
  0x17   :  { %v149_v41 = vsel %vm6_vm0, %v219_v40, %v218_v39  ;;  %v185_v44 = vsel %vm6_vm0, %v225_v43, %v224_v42  ;;  %v5_v46 = vld [vmem:[%s381_s0] ss:$16 sm:%s4_s25]  }
  0x1b   :  { %114 = vrot.lane.b32.xlu2 %v113_v34, %s251_s9 }
  0x1c   :  { %126 = vrot.lane.b32.xlu0 %v125_v28, %s249_s24  ;;  %s2_s24 = smov 3 }
  0x1d   :  { %138 = vrot.lane.b32.xlu1 %v137_v29, %s250_s29  ;;  %v3_v45 = vld [vmem:[%s381_s0] ss:$16 sm:%s2_s24]  }
  0x1e   :  { %v7_v47 = vsel %vm6_vm0, %v5_v46, %v3_v45  ;;  %vm188_vm0 = vcmask 130112  }
  0x1f   :  { %9 = vst.msk [vmem:[#allocation0] sm:$0xf] %vm8_vm1, %v7_v47  }
  0x23   :  { %150 = vrot.lane.b32.xlu2 %v149_v41, %s254_s18 }
  0x24   :  { %162 = vrot.lane.b32.xlu0 %v161_v37, %s252_s14 }
  0x25   :  { %174 = vrot.lane.b32.xlu1 %v173_v38, %s253_s15 }
  0x2b   :  { %186 = vrot.lane.b32.xlu2 %v185_v44, %s255_s23 }
  0x65   :  { %v67_v48 = vpop.permute.xlu2 %66  }
  0x6d   :  { %v79_v49 = vpop.permute.xlu2 %78  }
  0x75   :  { %v115_v52 = vpop.permute.xlu2 %114  }
  0x76   :  { %v19_v50 = vpop.permute.xlu0 %18  }
  0x77   :  { %21 = vst.msk [vmem:[#allocation0] sm:$0xf] %vm20_vm2, %v19_v50   ;;  %v43_v51 = vpop.permute.xlu1 %42  }
  0x7d   :  { %v151_v55 = vpop.permute.xlu2 %150  }
  0x7e   :  { %v31_v53 = vpop.permute.xlu0 %30  }
  0x7f   :  { %33 = vst.msk [vmem:[#allocation0] sm:$0xf] %vm32_vm3, %v31_v53   ;;  %v55_v54 = vpop.permute.xlu1 %54  }
  0x80   :  { %45 = vst.msk [vmem:[#allocation0] sm:$0xf] %vm44_vm4, %v43_v51  }
  0x81   :  { %57 = vst.msk [vmem:[#allocation0] sm:$0xf] %vm56_vm5, %v55_v54  }
  0x82   :  { %69 = vst.msk [vmem:[#allocation0] sm:$0xf] %vm68_vm6, %v67_v48  }
  0x83   :  { %81 = vst.msk [vmem:[#allocation0] sm:$0xf] %vm80_vm7, %v79_v49  }
  0x85   :  { %v187_v58 = vpop.permute.xlu2 %186  }
  0x86   :  { %v91_v56 = vpop.permute.xlu0 %90  }
  0x87   :  { %93 = vst.msk [vmem:[#allocation0] sm:$0xf] %vm92_vm8, %v91_v56   ;;  %v103_v57 = vpop.permute.xlu1 %102  }
  0x88   :  { %105 = vst.msk [vmem:[#allocation0] sm:$0xf] %vm104_vm9, %v103_v57  }
  0x89   :  { %117 = vst.msk [vmem:[#allocation0] sm:$0xf] %vm116_vm10, %v115_v52  }
  0x8e   :  { %v127_v59 = vpop.permute.xlu0 %126  }
  0x8f   :  { %129 = vst.msk [vmem:[#allocation0] sm:$0xf] %vm128_vm11, %v127_v59   ;;  %v139_v60 = vpop.permute.xlu1 %138  }
  0x90   :  { %141 = vst.msk [vmem:[#allocation0] sm:$0xf] %vm140_vm12, %v139_v60  }
  0x91   :  { %153 = vst.msk [vmem:[#allocation0] sm:$0xf] %vm152_vm13, %v151_v55  }
  0x96   :  { %v163_v61 = vpop.permute.xlu0 %162  }
  0x97   :  { %165 = vst.msk [vmem:[#allocation0] sm:$0xf] %vm164_vm14, %v163_v61   ;;  %v175_v62 = vpop.permute.xlu1 %174  }
  0x98   :  { %177 = vst.msk [vmem:[#allocation0] sm:$0xf] %vm176_vm15, %v175_v62  }
  0x99   :  { %189 = vst.msk [vmem:[#allocation0] sm:$0xf] %vm188_vm0, %v187_v58  }
  0xa0   :  { %v192_v63 = vld [vmem:[#allocation0] sm:$0xf] }
  0xa1   :  { %195 = vst [vmem:[%s382_s1] sm:$0xf] %v192_v63 }

// kernel: cos.1
= control target key start
LH: loop header
LB: loop body
LE: loop exit
PB: predicated region body
PF: predicated region fallthrough
CT: control target
= control target key end

     0   :  { %v168_v12 = vmov 683565275   ;;  %v169_v14 = vmov 2475754826   ;;  %v170_v16 = vmov 2131351028   ;;  %s245_s0 = inlined_call_operand.vmem [shape: f32[3], index: 0, kind: input, shape index: {}]   ;;  %s246_s1 = inlined_call_operand.vmem [shape: f32[3], index: 1, kind: output, shape index: {}]  }
   0x1   :  { %v188_v0 = vld [vmem:[%s245_s0] sm:$0x1]  ;;  %v171_v18 = vmov 2102212464   ;;  %v172_v20 = vmov 920167782  }
   0x2   :  { %v6_v1 = vand.u32 2139095040, %v188_v0  ;;  %v3_v3 = vand.u32 2147483647, %v188_v0  ;;  %v173_v26 = vmov 1326507024   ;;  %vm5_vm12 = vcmp.lt.s32.totalorder %v188_v0, 0 }
   0x4   :  { %v7_v2 = vshrl.u32 %v6_v1, 23  ;;  %v10_v6 = vand.u32 8388607, %v3_v3  ;;  %v174_v1 = vmov 0   ;;  %vm232_vm13 = vcmp.le.f32.partialorder %v3_v3, 0.7853982 }
   0x6   :  { %v158_v4 = vadd.s32 4294967169, %v7_v2  ;;  %v11_v9 = vor.u32 8388608, %v10_v6 }
   0x8   :  { %v13_v5 = vadd.s32 1, %v158_v4  ;;  %v197_v28 = vshll.u32 %v11_v9, 8 }
   0xa   :  { %vm14_vm0 = vcmp.gt.s32.totalorder %v13_v5, 0  ;;  %v52_v40 = vand.u32 65535, %v197_v28  ;;  %v53_v41 = vshrl.u32 %v197_v28, 16 }
   0xb   :  { %v15_v7 = vsel %vm14_vm0, %v13_v5, 0 }
   0xc   :  { %v17_v8 = vand.u32 31, %v15_v7  ;;  %v194_v10 = vshrl.u32 %v15_v7, 5 }
   0xe   :  { %v18_v11 = vsub.s32 32, %v17_v8  ;;  %v20_v13 = vshll.u32 %v168_v12, %v17_v8  ;;  %v23_v15 = vshll.u32 %v169_v14, %v17_v8  ;;  %v26_v17 = vshll.u32 %v170_v16, %v17_v8 }
   0xf   :  { %v29_v19 = vshll.u32 %v171_v18, %v17_v8  ;;  %v32_v21 = vshll.u32 %v172_v20, %v17_v8  ;;  %vm35_vm1 = vcmp.lt.s32.totalorder %v194_v10, 1  ;;  %vm38_vm2 = vcmp.lt.s32.totalorder %v194_v10, 4 }
  0x10   :  { %v21_v22 = vshrl.u32 %v169_v14, %v18_v11  ;;  %v24_v23 = vshrl.u32 %v170_v16, %v18_v11  ;;  %v27_v24 = vshrl.u32 %v171_v18, %v18_v11  ;;  %v30_v25 = vshrl.u32 %v172_v20, %v18_v11 }
  0x11   :  { %v33_v27 = vshrl.u32 %v173_v26, %v18_v11  ;;  %vm37_vm3 = vcmp.lt.s32.totalorder %v194_v10, 3  ;;  %vm36_vm4 = vcmp.lt.s32.totalorder %v194_v10, 2  ;;  %v19_v48 = vshrl.u32 %v168_v12, %v18_v11 }
  0x12   :  { %v22_v29 = vor.u32 %v21_v22, %v20_v13  ;;  %v25_v30 = vor.u32 %v24_v23, %v23_v15  ;;  %v28_v31 = vor.u32 %v27_v24, %v26_v17  ;;  %v31_v32 = vor.u32 %v30_v25, %v29_v19 }
  0x13   :  { %v34_v33 = vor.u32 %v33_v27, %v32_v21 }
  0x14   :  { %v43_v34 = vsel %vm35_vm1, %v22_v29, %v25_v30  ;;  %v47_v35 = vsel %vm35_vm1, %v25_v30, %v28_v31  ;;  %v44_v36 = vsel %vm38_vm2, %v31_v32, 920167782  ;;  %v39_v61 = vsel %vm35_vm1, %v19_v48, %v22_v29 }
  0x15   :  { %v48_v37 = vsel %vm38_vm2, %v34_v33, 1326507024  ;;  %v45_v38 = vsel %vm37_vm3, %v28_v31, %v44_v36  ;;  %v40_v63 = vsel %vm38_vm2, %v28_v31, 2102212464  ;;  %vm146_vm1 = vweird.f32 %v188_v0 }
  0x16   :  { %v49_v39 = vsel %vm37_vm3, %v31_v32, %v48_v37  ;;  %v46_v42 = vsel %vm36_vm4, %v43_v34, %v45_v38  ;;  %v41_v12 = vsel %vm37_vm3, %v25_v30, %v40_v63 }
  0x17   :  { %v50_v43 = vsel %vm36_vm4, %v47_v35, %v49_v39  ;;  %v76_v46 = vand.u32 65535, %v46_v42  ;;  %v77_v47 = vshrl.u32 %v46_v42, 16  ;;  %v42_v10 = vsel %vm36_vm4, %v39_v61, %v41_v12 }
  0x18   :  { %v54_v44 = vand.u32 65535, %v50_v43  ;;  %v55_v45 = vshrl.u32 %v50_v43, 16  ;;  %v96_v23 = vmul.u32 %v197_v28, %v42_v10 }
  0x19   :  { %v78_v52 = vmul.u32 %v76_v46, %v52_v40  ;;  %v79_v53 = vmul.u32 %v77_v47, %v52_v40  ;;  %v80_v54 = vmul.u32 %v76_v46, %v53_v41  ;;  %v81_v58 = vmul.u32 %v77_v47, %v53_v41 }
  0x1a   :  { %v56_v49 = vmul.u32 %v54_v44, %v52_v40  ;;  %v57_v50 = vmul.u32 %v55_v45, %v52_v40  ;;  %v58_v51 = vmul.u32 %v54_v44, %v53_v41  ;;  %v59_v55 = vmul.u32 %v55_v45, %v53_v41 }
  0x1b   :  { %v82_v59 = vshll.u32 %v79_v53, 16  ;;  %v84_v60 = vshll.u32 %v80_v54, 16  ;;  %v83_v9 = vshrl.u32 %v79_v53, 16  ;;  %v85_v16 = vshrl.u32 %v80_v54, 16 }
  0x1c   :  { %v60_v56 = vshll.u32 %v57_v50, 16  ;;  %v62_v57 = vshll.u32 %v58_v51, 16  ;;  %v61_v5 = vshrl.u32 %v57_v50, 16  ;;  %v63_v13 = vshrl.u32 %v58_v51, 16 }
  0x1d   :  { %vm86_vm6 = vc.u32 %v78_v52, %v82_v59  ;;  %v88_v4 = vadd.s32 %v82_v59, %v78_v52 }
  0x1e   :  { %vm64_vm5 = vc.u32 %v56_v49, %v60_v56  ;;  %v66_v62 = vadd.s32 %v60_v56, %v56_v49  ;;  %v87_v7 = vsel %vm86_vm6, 1, %v174_v1 }
  0x1f   :  { %v65_v2 = vsel %vm64_vm5, 1, %v174_v1  ;;  %v89_v11 = vadd.s32 %v87_v7, %v81_v58  ;;  %vm90_vm8 = vc.u32 %v88_v4, %v84_v60  ;;  %v92_v19 = vadd.s32 %v88_v4, %v84_v60 }
  0x20   :  { %v67_v6 = vadd.s32 %v65_v2, %v59_v55  ;;  %vm68_vm7 = vc.u32 %v66_v62, %v62_v57  ;;  %v91_v15 = vsel %vm90_vm8, 1, %v174_v1 }
  0x21   :  { %v69_v8 = vsel %vm68_vm7, 1, %v174_v1  ;;  %v93_v17 = vadd.s32 %v91_v15, %v89_v11 }
  0x22   :  { %v71_v14 = vadd.s32 %v69_v8, %v67_v6 }
  0x23   :  { %v94_v20 = vadd.s32 %v93_v17, %v83_v9 }
  0x24   :  { %v72_v18 = vadd.s32 %v71_v14, %v61_v5 }
  0x25   :  { %v95_v22 = vadd.s32 %v94_v20, %v85_v16 }
  0x26   :  { %v73_v21 = vadd.s32 %v72_v18, %v63_v13 }
  0x27   :  { %v99_v24 = vadd.s32 1, %v95_v22 }
  0x28   :  { %vm98_vm9 = vc.u32 %v73_v21, %v92_v19  ;;  %v97_v35 = vadd.s32 %v92_v19, %v73_v21 }
  0x29   :  { %v100_v25 = vsel %vm98_vm9, %v99_v24, %v95_v22 }
  0x2a   :  { %v101_v26 = vadd.s32 %v100_v25, %v96_v23 }
  0x2c   :  { %v102_v27 = vadd.s32 536870912, %v101_v26 }
  0x2e   :  { %v103_v28 = vshrl.u32 %v102_v27, 30 }
  0x30   :  { %v104_v29 = vshll.u32 %v103_v28, 30  ;;  %v127_v50 = vsub.s32 4, %v103_v28 }
  0x32   :  { %v105_v30 = vsub.s32 %v101_v26, %v104_v29  ;;  %v128_v55 = vsel %vm5_vm12, %v127_v50, %v103_v28 }
  0x33   :  { %v130_v58 = vsel %vm232_vm13, 0, %v128_v55 }
  0x34   :  { %vm106_vm10 = vcmp.lt.s32.totalorder %v105_v30, 0  ;;  %v107_v31 = vsub.s32 0, %v105_v30  ;;  %v147_v63 = vand.u32 3, %v130_v58 }
  0x36   :  { %v108_v32 = vsel %vm106_vm10, %v107_v31, %v105_v30  ;;  %vm152_vm14 = vcmp.eq.s32.totalorder %v147_v63, 2  ;;  %vm149_vm15 = vcmp.eq.s32.totalorder %v147_v63, 0  ;;  %vm148_vm0 = vcmp.lt.s32.totalorder %v147_v63, 2 }
  0x37   :  { %v109_v33 = vclz %v108_v32 }
  0x39   :  { %v159_v34 = vadd.s32 4294967294, %v109_v33 }
  0x3b   :  { %vm160_vm11 = vcmp.lt.s32.totalorder %v159_v34, 0 }
  0x3c   :  { %v112_v36 = vsel %vm160_vm11, 0, %v159_v34 }
  0x3d   :  { %v113_v37 = vsub.s32 32, %v112_v36  ;;  %v114_v38 = vshll.u32 %v105_v30, %v112_v36  ;;  %v117_v39 = vsub.s32 4294967266, %v112_v36 }
  0x3f   :  { %v115_v40 = vshrl.u32 %v97_v35, %v113_v37  ;;  %v118_v41 = vadd.s32 127, %v117_v39 }
  0x41   :  { %v116_v42 = vor.u32 %v115_v40, %v114_v38  ;;  %v119_v43 = vshll.u32 %v118_v41, 23 }
  0x43   :  { %v120_v44 = vor.u32 4788187, %v119_v43  ;;  %v123_v45 = vcvt.s32.f32 %v116_v42 }
  0x45   :  { %v121_v46 = vand.u32 2147483647, %v120_v44 }
  0x47   :  { %v124_v47 = vmul.f32 %v123_v45, %v121_v46 }
  0x49   :  { %v125_v48 = vxor.u32 2147483648, %v124_v47 }
  0x4b   :  { %v126_v49 = vsel %vm5_vm12, %v125_v48, %v124_v47 }
  0x4c   :  { %v129_v51 = vsel %vm232_vm13, %v188_v0, %v126_v49 }
  0x4d   :  { %v131_v52 = vmul.f32 %v129_v51, %v129_v51 }
  0x4f   :  { %v132_v53 = vmul.f32 -0.001358992, %v131_v52  ;;  %v139_v54 = vmul.f32 -0.00019511016, %v131_v52 }
  0x51   :  { %v133_v56 = vadd.f32 0.041655596, %v132_v53  ;;  %v140_v57 = vadd.f32 0.008332121, %v139_v54 }
  0x53   :  { %v134_v59 = vmul.f32 %v133_v56, %v131_v52  ;;  %v141_v60 = vmul.f32 %v140_v57, %v131_v52 }
  0x55   :  { %v135_v61 = vadd.f32 -0.4999988, %v134_v59  ;;  %v142_v62 = vadd.f32 -0.16666654, %v141_v60 }
  0x57   :  { %v136_v1 = vmul.f32 %v135_v61, %v131_v52  ;;  %v143_v2 = vmul.f32 %v142_v62, %v131_v52 }
  0x59   :  { %v137_v4 = vadd.f32 1.0, %v136_v1  ;;  %v144_v5 = vadd.f32 1.0, %v143_v2 }
  0x5b   :  { %v145_v6 = vmul.f32 %v144_v5, %v129_v51  ;;  %v153_v7 = vxor.u32 2147483648, %v137_v4 }
  0x5d   :  { %v150_v8 = vxor.u32 2147483648, %v145_v6  ;;  %v154_v9 = vsel %vm152_vm14, %v153_v7, %v145_v6 }
  0x5f   :  { %v151_v0 = vsel %vm149_vm15, %v137_v4, %v150_v8 }
  0x60   :  { %v155_v11 = vsel %vm148_vm0, %v151_v0, %v154_v9 }
  0x61   :  { %v156_v12 = vsel %vm146_vm1, nan, %v155_v11 }
  0x62   :  { %157 = vst [vmem:[%s246_s1] sm:$0x1] %v156_v12 }

// kernel: tile.14
= control target key start
LH: loop header
LB: loop body
LE: loop exit
PB: predicated region body
PF: predicated region fallthrough
CT: control target
= control target key end

     0   :  { %vm6_vm0 = vcmask 1042434   ;;  %s11_s6 = smov 3  ;;  %s33_s11 = smov 3  ;;  %vm8_vm1 = vcmask 64512   ;;  %vm19_vm2 = vcmask 1048512   ;;  %vm30_vm3 = vcmask 982912   ;;  %s367_s0 = inlined_call_operand.vmem [shape: f32[3,16,8], index: 0, kind: input, shape index: {}]   ;;  %s368_s1 = inlined_call_operand.vmem [shape: f32[3,128], index: 1, kind: output, shape index: {}]  }
   0x1   :  { %v183_v0 = vld [vmem:[%s367_s0 + $0x2d] sm:$0x4]   ;;  %v187_v2 = vld [vmem:[%s367_s0 + $0x2b] sm:$0x4]   ;;  %s22_s16 = smov 3  ;;  %s227_s17 = smov 120  }
   0x2   :  { %v182_v1 = vld [vmem:[%s367_s0 + $0xf] ss:$16 sm:%s11_s6]   ;;  %v186_v4 = vld [vmem:[%s367_s0 + $0xd] ss:$16 sm:%s33_s11]   ;;  %s44_s18 = smov 3  ;;  %s228_s19 = smov 104  }
   0x3   :  { %v16_v3 = vsel %vm6_vm0, %v183_v0, %v182_v1  ;;  %v38_v5 = vsel %vm6_vm0, %v187_v2, %v186_v4  ;;  %v184_v6 = vld [vmem:[%s367_s0 + $0xe] ss:$16 sm:%s22_s16]   ;;  %v188_v8 = vld [vmem:[%s367_s0 + $0xc] ss:$16 sm:%s44_s18]   ;;  %s55_s28 = smov 3  ;;  %s77_s2 = smov 3 }
   0x4   :  { %17 = vrot.lane.b32.xlu0 %v16_v3, %s227_s17  ;;  %39 = vrot.lane.b32.xlu1 %v38_v5, %s228_s19  ;;  %v185_v7 = vld [vmem:[%s367_s0 + $0x2c] sm:$0x4]   ;;  %v189_v9 = vld [vmem:[%s367_s0 + $0x2a] sm:$0x4]   ;;  %s229_s5 = smov 112   ;;  %s88_s6 = smov 3 }
   0x5   :  { %v27_v10 = vsel %vm6_vm0, %v185_v7, %v184_v6  ;;  %v191_v11 = vld [vmem:[%s367_s0 + $0x29] sm:$0x4]   ;;  %v49_v12 = vsel %vm6_vm0, %v189_v9, %v188_v8  ;;  %s230_s7 = smov 88   ;;  %s66_s8 = smov 3  ;;  %v194_v15 = vld [vmem:[%s367_s0 + $0x9] ss:$16 sm:%s77_s2]  }
   0x6   :  { %v190_v13 = vld [vmem:[%s367_s0 + $0xb] ss:$16 sm:%s55_s28]   ;;  %s231_s9 = smov 96   ;;  %v195_v16 = vld [vmem:[%s367_s0 + $0x27] sm:$0x4]   ;;  %s110_s22 = smov 3 }
   0x7   :  { %v60_v14 = vsel %vm6_vm0, %v191_v11, %v190_v13  ;;  %v192_v17 = vld [vmem:[%s367_s0 + $0xa] ss:$16 sm:%s66_s8]   ;;  %v196_v19 = vld [vmem:[%s367_s0 + $0x8] ss:$16 sm:%s88_s6]   ;;  %v82_v21 = vsel %vm6_vm0, %v195_v16, %v194_v15  ;;  %s99_s23 = smov 3  ;;  %s232_s24 = smov 72  }
   0x8   :  { %61 = vrot.lane.b32.xlu2 %v60_v14, %s230_s7  ;;  %v193_v18 = vld [vmem:[%s367_s0 + $0x28] sm:$0x4]   ;;  %v197_v20 = vld [vmem:[%s367_s0 + $0x26] sm:$0x4]   ;;  %s121_s25 = smov 3  ;;  %s233_s26 = smov 80  }
   0x9   :  { %v71_v22 = vsel %vm6_vm0, %v193_v18, %v192_v17  ;;  %v93_v23 = vsel %vm6_vm0, %v197_v20, %v196_v19  ;;  %s234_s27 = smov 64   ;;  %v200_v24 = vld [vmem:[%s367_s0 + $0x6] ss:$16 sm:%s110_s22]   ;;  %v198_v26 = vld [vmem:[%s367_s0 + $0x7] ss:$16 sm:%s99_s23]   ;;  %s143_s11 = smov 3 }
   0xa   :  { %v201_v25 = vld [vmem:[%s367_s0 + $0x24] sm:$0x4]   ;;  %v199_v27 = vld [vmem:[%s367_s0 + $0x25] sm:$0x4]   ;;  %v202_v28 = vld [vmem:[%s367_s0 + $0x5] ss:$16 sm:%s121_s25]  }
   0xb   :  { %v203_v29 = vld [vmem:[%s367_s0 + $0x23] sm:$0x4]   ;;  %v115_v30 = vsel %vm6_vm0, %v201_v25, %v200_v24  ;;  %v104_v31 = vsel %vm6_vm0, %v199_v27, %v198_v26  ;;  %s132_s12 = smov 3  ;;  %s235_s13 = smov 48   ;;  %v206_v33 = vld [vmem:[%s367_s0 + $0x3] ss:$16 sm:%s143_s11]  }
   0xc   :  { %28 = vrot.lane.b32.xlu0 %v27_v10, %s229_s5  ;;  %50 = vrot.lane.b32.xlu1 %v49_v12, %s231_s9  ;;  %v126_v32 = vsel %vm6_vm0, %v203_v29, %v202_v28  ;;  %s154_s14 = smov 3  ;;  %s236_s15 = smov 56   ;;  %v207_v34 = vld [vmem:[%s367_s0 + $0x21] sm:$0x4]   ;;  %v205_v36 = vld [vmem:[%s367_s0 + $0x22] sm:$0x4]  }
   0xd   :  { %s237_s16 = smov 40   ;;  %v204_v35 = vld [vmem:[%s367_s0 + $0x4] ss:$16 sm:%s132_s12]   ;;  %v208_v37 = vld [vmem:[%s367_s0 + $0x2] ss:$16 sm:%s154_s14]   ;;  %v148_v39 = vsel %vm6_vm0, %v207_v34, %v206_v33  ;;  %s165_s29 = smov 3 }
   0xe   :  { %v209_v38 = vld [vmem:[%s367_s0 + $0x20] sm:$0x4]   ;;  %v137_v40 = vsel %vm6_vm0, %v205_v36, %v204_v35  ;;  %s238_s30 = smov 24   ;;  %s239_s2 = smov 32   ;;  %v210_v42 = vld [vmem:[%s367_s0 + $0x1] ss:$16 sm:%s165_s29]  }
   0xf   :  { %v159_v41 = vsel %vm6_vm0, %v209_v38, %v208_v37  ;;  %s240_s3 = smov 16   ;;  %v211_v43 = vld [vmem:[%s367_s0 + $0x1f] sm:$0x4]   ;;  %s241_s8 = smov 8   ;;  %v181_v46 = vld [vmem:[%s367_s0 + $0x1e] sm:$0x4]  }
  0x10   :  { %72 = vrot.lane.b32.xlu2 %v71_v22, %s233_s26  ;;  %v170_v44 = vsel %vm6_vm0, %v211_v43, %v210_v42  ;;  %s2_s9 = smov 3  ;;  %vm41_vm4 = vcmask 917312   ;;  %vm52_vm5 = vcmask 851712   ;;  %vm63_vm6 = vcmask 786112  }
  0x11   :  { %v3_v45 = vld [vmem:[%s367_s0] ss:$16 sm:%s2_s9]   ;;  %vm74_vm7 = vcmask 720512   ;;  %vm85_vm8 = vcmask 654912   ;;  %vm96_vm9 = vcmask 589312   ;;  %vm107_vm10 = vcmask 523712  }
  0x12   :  { %v7_v47 = vsel %vm6_vm0, %v181_v46, %v3_v45  ;;  %vm118_vm11 = vcmask 458112   ;;  %vm129_vm12 = vcmask 392512   ;;  %vm140_vm13 = vcmask 326912  }
  0x13   :  { %9 = vst.msk [vmem:[#allocation0] sm:$0x7] %vm8_vm1, %v7_v47   ;;  %vm151_vm14 = vcmask 261312   ;;  %vm162_vm15 = vcmask 195712   ;;  %vm173_vm0 = vcmask 130112  }
  0x14   :  { %83 = vrot.lane.b32.xlu0 %v82_v21, %s232_s24  ;;  %94 = vrot.lane.b32.xlu1 %v93_v23, %s234_s27 }
  0x18   :  { %105 = vrot.lane.b32.xlu2 %v104_v31, %s236_s15 }
  0x1c   :  { %116 = vrot.lane.b32.xlu0 %v115_v30, %s235_s13  ;;  %127 = vrot.lane.b32.xlu1 %v126_v32, %s237_s16 }
  0x20   :  { %138 = vrot.lane.b32.xlu2 %v137_v40, %s239_s2 }
  0x24   :  { %149 = vrot.lane.b32.xlu0 %v148_v39, %s238_s30  ;;  %160 = vrot.lane.b32.xlu1 %v159_v41, %s240_s3 }
  0x28   :  { %171 = vrot.lane.b32.xlu2 %v170_v44, %s241_s8 }
  0x62   :  { %v62_v48 = vpop.permute.xlu2 %61  }
  0x6a   :  { %v73_v49 = vpop.permute.xlu2 %72  }
  0x72   :  { %v106_v51 = vpop.permute.xlu2 %105  }
  0x76   :  { %v18_v50 = vpop.permute.xlu0 %17   ;;  %v40_v52 = vpop.permute.xlu1 %39  }
  0x77   :  { %20 = vst.msk [vmem:[#allocation0] sm:$0x7] %vm19_vm2, %v18_v50  }
  0x7a   :  { %v139_v54 = vpop.permute.xlu2 %138  }
  0x7e   :  { %v29_v53 = vpop.permute.xlu0 %28   ;;  %v51_v55 = vpop.permute.xlu1 %50  }
  0x7f   :  { %31 = vst.msk [vmem:[#allocation0] sm:$0x7] %vm30_vm3, %v29_v53  }
  0x80   :  { %42 = vst.msk [vmem:[#allocation0] sm:$0x7] %vm41_vm4, %v40_v52  }
  0x81   :  { %53 = vst.msk [vmem:[#allocation0] sm:$0x7] %vm52_vm5, %v51_v55  }
  0x82   :  { %64 = vst.msk [vmem:[#allocation0] sm:$0x7] %vm63_vm6, %v62_v48   ;;  %v172_v57 = vpop.permute.xlu2 %171  }
  0x83   :  { %75 = vst.msk [vmem:[#allocation0] sm:$0x7] %vm74_vm7, %v73_v49  }
  0x86   :  { %v84_v56 = vpop.permute.xlu0 %83   ;;  %v95_v58 = vpop.permute.xlu1 %94  }
  0x87   :  { %86 = vst.msk [vmem:[#allocation0] sm:$0x7] %vm85_vm8, %v84_v56  }
  0x88   :  { %97 = vst.msk [vmem:[#allocation0] sm:$0x7] %vm96_vm9, %v95_v58  }
  0x89   :  { %108 = vst.msk [vmem:[#allocation0] sm:$0x7] %vm107_vm10, %v106_v51  }
  0x8e   :  { %v117_v59 = vpop.permute.xlu0 %116   ;;  %v128_v60 = vpop.permute.xlu1 %127  }
  0x8f   :  { %119 = vst.msk [vmem:[#allocation0] sm:$0x7] %vm118_vm11, %v117_v59  }
  0x90   :  { %130 = vst.msk [vmem:[#allocation0] sm:$0x7] %vm129_vm12, %v128_v60  }
  0x91   :  { %141 = vst.msk [vmem:[#allocation0] sm:$0x7] %vm140_vm13, %v139_v54  }
  0x96   :  { %v150_v61 = vpop.permute.xlu0 %149   ;;  %v161_v62 = vpop.permute.xlu1 %160  }
  0x97   :  { %152 = vst.msk [vmem:[#allocation0] sm:$0x7] %vm151_vm14, %v150_v61  }
  0x98   :  { %163 = vst.msk [vmem:[#allocation0] sm:$0x7] %vm162_vm15, %v161_v62  }
  0x99   :  { %174 = vst.msk [vmem:[#allocation0] sm:$0x7] %vm173_vm0, %v172_v57  }
  0xa0   :  { %v177_v63 = vld [vmem:[#allocation0] sm:$0xf] }
  0xa1   :  { %180 = vst [vmem:[%s368_s1] sm:$0xf] %v177_v63 }

// kernel: quantum_kan_regressor.1
= control target key start
LH: loop header
LB: loop body
LE: loop exit
PB: predicated region body
PF: predicated region fallthrough
CT: control target
= control target key end

     0   :  { %vm169_vm0 = vcmask 130048   ;;  %s390_s2 = inlined_call_operand.vmem [shape: f32[128,16], index: 2, kind: input, shape index: {}]   ;;  %s391_s0 = inlined_call_operand.vmem [shape: f32[32,128], index: 0, kind: input, shape index: {}]   ;;  %s392_s1 = inlined_call_operand.vmem [shape: f32[7,128], index: 1, kind: input, shape index: {}]   ;;  %s393_s3 = inlined_call_operand.<no memory space> [shape: f32[1,1], index: 3, kind: input, shape index: {}]   ;;  %s394_s4 = inlined_call_operand.vmem [shape: f32[32,16], index: 4, kind: output, shape index: {}]  }
   0x1   :  { %v137_v0 = vld [vmem:[%s390_s2 + $0x78] sm:$0xff]  ;;  %v136_v1 = vld [vmem:[%s390_s2 + $0x70] sm:$0xff]  ;;  %v135_v2 = vld [vmem:[%s390_s2 + $0x68] sm:$0xff] }
   0x2   :  { %187 = vmatpush.msra.mxu2 %v137_v0  ;;  %188 = vmatpush.msra.mxu3 %v137_v0  ;;  %v134_v3 = vld [vmem:[%s390_s2 + $0x60] sm:$0xff]  ;;  %v133_v4 = vld [vmem:[%s390_s2 + $0x58] sm:$0xff]  ;;  %v20_v5 = vld [vmem:[%s391_s0 + $0x10] sm:$0xff] }
   0x3   :  { %140 = vmatpush.msra.mxu0 %v137_v0  ;;  %186 = vmatpush.msra.mxu1 %v137_v0  ;;  %234 = vtanh.f32 %v20_v5  ;;  %v21_v6 = vld [vmem:[%s391_s0 + $0x18] sm:$0xff]  ;;  %v18_v7 = vld [vmem:[%s391_s0] sm:$0xff]  ;;  %v19_v8 = vld [vmem:[%s391_s0 + $0x8] sm:$0xff] }
   0x4   :  { %190 = vmatpush.msra.mxu2 %v136_v1  ;;  %191 = vmatpush.msra.mxu3 %v136_v1  ;;  %236 = vtanh.f32 %v21_v6  ;;  %v132_v9 = vld [vmem:[%s390_s2 + $0x50] sm:$0xff]  ;;  %v131_v10 = vld [vmem:[%s390_s2 + $0x48] sm:$0xff]  ;;  %v311_v11 = vld [vmem:[%s392_s1] sm:$0x7f] }
   0x5   :  { %141 = vmatpush.msra.mxu0 %v136_v1  ;;  %189 = vmatpush.msra.mxu1 %v136_v1  ;;  %238 = vtanh.f32 %v18_v7  ;;  %v130_v13 = vld [vmem:[%s390_s2 + $0x40] sm:$0xff]  ;;  %v31_v16 = vperm.slane %v311_v11, 0  ;;  %v129_v18 = vld [vmem:[%s390_s2 + $0x38] sm:$0xff]  ;;  %v44_v22 = vperm.slane %v311_v11, 1  ;;  %v128_v24 = vld [vmem:[%s390_s2 + $0x30] sm:$0xff]  ;;  %v61_v31 = vperm.slane %v311_v11, 2 }
   0x6   :  { %193 = vmatpush.msra.mxu2 %v135_v2  ;;  %194 = vmatpush.msra.mxu3 %v135_v2  ;;  %240 = vtanh.f32 %v19_v8  ;;  %v127_v30 = vld [vmem:[%s390_s2 + $0x28] sm:$0xff]  ;;  %v126_v39 = vld [vmem:[%s390_s2 + $0x20] sm:$0xff]  ;;  %v125_v47 = vld [vmem:[%s390_s2 + $0x18] sm:$0xff] }
   0x7   :  { %142 = vmatpush.msra.mxu0 %v135_v2  ;;  %192 = vmatpush.msra.mxu1 %v135_v2  ;;  %v124_v54 = vld [vmem:[%s390_s2 + $0x10] sm:$0xff]  ;;  %v123_v60 = vld [vmem:[%s390_s2 + $0x8] sm:$0xff]  ;;  %v122_v0 = vld [vmem:[%s390_s2] sm:$0xff] }
   0x8   :  { %196 = vmatpush.msra.mxu2 %v134_v3  ;;  %197 = vmatpush.msra.mxu3 %v134_v3 }
   0x9   :  { %143 = vmatpush.msra.mxu0 %v134_v3  ;;  %195 = vmatpush.msra.mxu1 %v134_v3  ;;  %v313_v12 = vpop.eup %234  ;;  %v78_v3 = vperm.slane %v311_v11, 4 }
   0xa   :  { %199 = vmatpush.msra.mxu2 %v133_v4  ;;  %200 = vmatpush.msra.mxu3 %v133_v4  ;;  %v318_v14 = vpop.eup %236  ;;  %v29_v15 = vadd.f32 %v313_v12, %v313_v12  ;;  %v34_v27 = vmul.f32 %v313_v12, %v31_v16 }
   0xb   :  { %144 = vmatpush.msra.mxu0 %v133_v4  ;;  %198 = vmatpush.msra.mxu1 %v133_v4  ;;  %v323_v17 = vpop.eup %238  ;;  %v30_v19 = vadd.f32 %v318_v14, %v318_v14  ;;  %v35_v32 = vmul.f32 %v318_v14, %v31_v16 }
   0xc   :  { %202 = vmatpush.msra.mxu2 %v132_v9  ;;  %203 = vmatpush.msra.mxu3 %v132_v9  ;;  %v330_v20 = vpop.eup %240  ;;  %v38_v21 = vmul.f32 %v313_v12, %v29_v15  ;;  %v27_v23 = vadd.f32 %v323_v17, %v323_v17  ;;  %v32_v37 = vmul.f32 %v323_v17, %v31_v16 }
   0xd   :  { %145 = vmatpush.msra.mxu0 %v132_v9  ;;  %201 = vmatpush.msra.mxu1 %v132_v9  ;;  %v39_v25 = vmul.f32 %v318_v14, %v30_v19  ;;  %v28_v26 = vadd.f32 %v330_v20, %v330_v20  ;;  %v33_v42 = vmul.f32 %v330_v20, %v31_v16  ;;  %v83_v9 = vperm.slane %v311_v11, 3 }
   0xe   :  { %205 = vmatpush.msra.mxu2 %v131_v10  ;;  %206 = vmatpush.msra.mxu3 %v131_v10  ;;  %v180_v28 = vadd.f32 -1.0, %v38_v21  ;;  %v36_v29 = vmul.f32 %v323_v17, %v27_v23 }
   0xf   :  { %146 = vmatpush.msra.mxu0 %v131_v10  ;;  %204 = vmatpush.msra.mxu1 %v131_v10  ;;  %v181_v33 = vadd.f32 -1.0, %v39_v25  ;;  %v37_v34 = vmul.f32 %v330_v20, %v28_v26 }
  0x10   :  { %208 = vmatpush.msra.mxu2 %v130_v13  ;;  %209 = vmatpush.msra.mxu3 %v130_v13  ;;  %v47_v35 = vmul.f32 %v180_v28, %v44_v22  ;;  %v55_v36 = vmul.f32 %v180_v28, %v29_v15  ;;  %v178_v38 = vadd.f32 -1.0, %v36_v29  ;;  %v96_v15 = vperm.slane %v311_v11, 5 }
  0x11   :  { %147 = vmatpush.msra.mxu0 %v130_v13  ;;  %207 = vmatpush.msra.mxu1 %v130_v13  ;;  %v48_v40 = vmul.f32 %v181_v33, %v44_v22  ;;  %v56_v41 = vmul.f32 %v181_v33, %v30_v19  ;;  %v179_v43 = vadd.f32 -1.0, %v37_v34 }
  0x12   :  { %211 = vmatpush.msra.mxu2 %v129_v18  ;;  %212 = vmatpush.msra.mxu3 %v129_v18  ;;  %v51_v44 = vadd.f32 %v47_v35, %v34_v27  ;;  %v59_v45 = vsub.f32 %v55_v36, %v313_v12  ;;  %v45_v46 = vmul.f32 %v178_v38, %v44_v22 }
  0x13   :  { %148 = vmatpush.msra.mxu0 %v129_v18  ;;  %210 = vmatpush.msra.mxu1 %v129_v18  ;;  %v52_v48 = vadd.f32 %v48_v40, %v35_v32  ;;  %v60_v49 = vsub.f32 %v56_v41, %v318_v14  ;;  %v53_v50 = vmul.f32 %v178_v38, %v27_v23 }
  0x14   :  { %214 = vmatpush.msra.mxu2 %v128_v24  ;;  %215 = vmatpush.msra.mxu3 %v128_v24  ;;  %v64_v51 = vmul.f32 %v61_v31, %v59_v45  ;;  %v49_v52 = vadd.f32 %v45_v46, %v32_v37  ;;  %v46_v53 = vmul.f32 %v179_v43, %v44_v22  ;;  %v113_v22 = vperm.slane %v311_v11, 6 }
  0x15   :  { %149 = vmatpush.msra.mxu0 %v128_v24  ;;  %213 = vmatpush.msra.mxu1 %v128_v24  ;;  %v65_v55 = vmul.f32 %v61_v31, %v60_v49  ;;  %v57_v56 = vsub.f32 %v53_v50, %v323_v17  ;;  %v54_v57 = vmul.f32 %v179_v43, %v28_v26 }
  0x16   :  { %217 = vmatpush.msra.mxu2 %v127_v30  ;;  %218 = vmatpush.msra.mxu3 %v127_v30  ;;  %v68_v58 = vadd.f32 %v64_v51, %v51_v44  ;;  %v50_v59 = vadd.f32 %v46_v53, %v33_v42 }
  0x17   :  { %150 = vmatpush.msra.mxu0 %v127_v30  ;;  %216 = vmatpush.msra.mxu1 %v127_v30  ;;  %v69_v61 = vadd.f32 %v65_v55, %v52_v48  ;;  %v62_v62 = vmul.f32 %v61_v31, %v57_v56  ;;  %v58_v63 = vsub.f32 %v54_v57, %v330_v20  ;;  %v139_v56 = vstv %s393_s3 }
  0x18   :  { %220 = vmatpush.msra.mxu2 %v126_v39  ;;  %221 = vmatpush.msra.mxu3 %v126_v39  ;;  %242 = vtanh.f32 %v68_v58 }
  0x19   :  { %151 = vmatpush.msra.mxu0 %v126_v39  ;;  %219 = vmatpush.msra.mxu1 %v126_v39  ;;  %244 = vtanh.f32 %v69_v61  ;;  %v66_v1 = vadd.f32 %v62_v62, %v49_v52  ;;  %v63_v2 = vmul.f32 %v61_v31, %v58_v63 }
  0x1a   :  { %223 = vmatpush.msra.mxu2 %v125_v47  ;;  %224 = vmatpush.msra.mxu3 %v125_v47 }
  0x1b   :  { %152 = vmatpush.msra.mxu0 %v125_v47  ;;  %222 = vmatpush.msra.mxu1 %v125_v47  ;;  %246 = vtanh.f32 %v66_v1  ;;  %v67_v4 = vadd.f32 %v63_v2, %v50_v59 }
  0x1c   :  { %226 = vmatpush.msra.mxu2 %v124_v54  ;;  %227 = vmatpush.msra.mxu3 %v124_v54 }
  0x1d   :  { %153 = vmatpush.msra.mxu0 %v124_v54  ;;  %225 = vmatpush.msra.mxu1 %v124_v54  ;;  %248 = vtanh.f32 %v67_v4 }
  0x1e   :  { %229 = vmatpush.msra.mxu2 %v123_v60  ;;  %230 = vmatpush.msra.mxu3 %v123_v60  ;;  %v243_v5 = vpop.eup %242 }
  0x1f   :  { %154 = vmatpush.msra.mxu0 %v123_v60  ;;  %228 = vmatpush.msra.mxu1 %v123_v60  ;;  %v245_v6 = vpop.eup %244  ;;  %v76_v7 = vadd.f32 %v243_v5, %v243_v5  ;;  %v81_v8 = vmul.f32 %v243_v5, %v78_v3 }
  0x20   :  { %232 = vmatpush.msra.mxu2 %v122_v0  ;;  %233 = vmatpush.msra.mxu3 %v122_v0  ;;  %v77_v10 = vadd.f32 %v245_v6, %v245_v6  ;;  %v82_v12 = vmul.f32 %v245_v6, %v78_v3 }
  0x21   :  { %155 = vmatpush.msra.mxu0 %v122_v0  ;;  %231 = vmatpush.msra.mxu1 %v122_v0  ;;  %v247_v13 = vpop.eup %246  ;;  %v90_v14 = vmul.f32 %v243_v5, %v76_v7  ;;  %v86_v20 = vadd.f32 %v83_v9, %v81_v8 }
  0x22   :  { %v91_v16 = vmul.f32 %v245_v6, %v77_v10  ;;  %v74_v17 = vadd.f32 %v247_v13, %v247_v13  ;;  %v79_v18 = vmul.f32 %v247_v13, %v78_v3  ;;  %v87_v23 = vadd.f32 %v83_v9, %v82_v12 }
  0x23   :  { %v249_v19 = vpop.eup %248  ;;  %v184_v21 = vadd.f32 -1.0, %v90_v14 }
  0x24   :  { %v185_v24 = vadd.f32 -1.0, %v91_v16  ;;  %v88_v25 = vmul.f32 %v247_v13, %v74_v17  ;;  %v75_v26 = vadd.f32 %v249_v19, %v249_v19  ;;  %v84_v29 = vadd.f32 %v83_v9, %v79_v18 }
  0x25   :  { %v99_v27 = vmul.f32 %v184_v21, %v96_v15  ;;  %v107_v28 = vmul.f32 %v184_v21, %v76_v7  ;;  %v80_v30 = vmul.f32 %v249_v19, %v78_v3 }
  0x26   :  { %v100_v31 = vmul.f32 %v185_v24, %v96_v15  ;;  %v108_v32 = vmul.f32 %v185_v24, %v77_v10  ;;  %v182_v33 = vadd.f32 -1.0, %v88_v25  ;;  %v89_v34 = vmul.f32 %v249_v19, %v75_v26 }
  0x27   :  { %v103_v35 = vadd.f32 %v99_v27, %v86_v20  ;;  %v111_v36 = vsub.f32 %v107_v28, %v243_v5  ;;  %v85_v11 = vadd.f32 %v83_v9, %v80_v30 }
  0x28   :  { %v104_v37 = vadd.f32 %v100_v31, %v87_v23  ;;  %v112_v38 = vsub.f32 %v108_v32, %v245_v6  ;;  %v97_v39 = vmul.f32 %v182_v33, %v96_v15  ;;  %v105_v40 = vmul.f32 %v182_v33, %v74_v17 }
  0x29   :  { %v116_v41 = vmul.f32 %v113_v22, %v111_v36  ;;  %v183_v42 = vadd.f32 -1.0, %v89_v34 }
  0x2a   :  { %v117_v43 = vmul.f32 %v113_v22, %v112_v38  ;;  %v101_v44 = vadd.f32 %v97_v39, %v84_v29  ;;  %v109_v45 = vsub.f32 %v105_v40, %v247_v13 }
  0x2b   :  { %v120_v46 = vadd.f32 %v116_v41, %v103_v35  ;;  %v98_v47 = vmul.f32 %v183_v42, %v96_v15  ;;  %v106_v48 = vmul.f32 %v183_v42, %v75_v26 }
  0x2c   :  { %v121_v49 = vadd.f32 %v117_v43, %v104_v37  ;;  %v114_v50 = vmul.f32 %v113_v22, %v109_v45 }
  0x2d   :  { %162 = vmatmul.f32.vlgmr.msra.gmra.mxu2 %v120_v46  ;;  %v102_v51 = vadd.f32 %v98_v47, %v85_v11  ;;  %v110_v52 = vsub.f32 %v106_v48, %v249_v19 }
  0x2e   :  { %165 = vmatmul.f32.vlgmr.msra.gmra.mxu3 %v121_v49  ;;  %v118_v53 = vadd.f32 %v114_v50, %v101_v44 }
  0x2f   :  { %v115_v54 = vmul.f32 %v113_v22, %v110_v52 }
  0x30   :  { %156 = vmatmul.f32.vlgmr.msra.gmra.mxu0 %v118_v53 }
  0x31   :  { %v119_v55 = vadd.f32 %v115_v54, %v102_v51 }
  0x33   :  { %159 = vmatmul.f32.vlgmr.msra.gmra.mxu1 %v119_v55 }
  0xad   :  { %v157_v57 = vpop.f32.mrf.mxu0 }
  0xae   :  { %v158_v58 = vadd.f32 %v157_v57, %v139_v56 }
  0xb0   :  { %170 = vst.msk [vmem:[%s394_s4] sm:$0xff] %vm169_vm0, %v158_v58  ;;  %v160_v59 = vpop.f32.mrf.mxu1  ;;  %v163_v60 = vpop.f32.mrf.mxu2 }
  0xb1   :  { %v161_v61 = vadd.f32 %v160_v59, %v139_v56  ;;  %v164_v62 = vadd.f32 %v163_v60, %v139_v56  ;;  %v166_v63 = vpop.f32.mrf.mxu3 }
  0xb2   :  { %v167_v0 = vadd.f32 %v166_v63, %v139_v56 }
  0xb3   :  { %171 = vst.msk [vmem:[%s394_s4 + $0x8] sm:$0xff] %vm169_vm0, %v161_v61 }
  0xb4   :  { %172 = vst.msk [vmem:[%s394_s4 + $0x10] sm:$0xff] %vm169_vm0, %v164_v62 }
  0xb5   :  { %173 = vst.msk [vmem:[%s394_s4 + $0x18] sm:$0xff] %vm169_vm0, %v167_v0 }

</bundles_post_ra>
